<compile_context>
chip_gen: v7x
topology: tpu7x:2x2x1
jax: 0.10.0
libtpu: 0.0.40
codegen_flags: <defaults>
</compile_context>

<pallas_src>
import functools

import jax
import jax.numpy as jnp
from jax.experimental import pallas as pl
from jax.experimental.pallas import tpu as pltpu


# ---------------------------------------------------------------------------
# Path 1: VMEM-resident table, pure vector gather.
# ---------------------------------------------------------------------------
def _gather_resident_kernel(ids_ref, table_ref, out_ref, *, tile_tokens, group):
    """ids_ref: (n_tiles, tile_tokens) int32 in SMEM (scalar prefetch)
    table_ref: (V/group, group, E_pad) table resident in VMEM
    out_ref:   (tile_tokens, E_pad) output block in VMEM
    """
    tile = pl.program_id(0)
    e_pad = out_ref.shape[-1]
    lg = group.bit_length() - 1                    # group is a power of two
    # Sublane-index iota, hoisted out of the per-token loop.
    sub_iota = jax.lax.broadcasted_iota(jnp.int32, (group, e_pad), 0)

    for t in range(tile_tokens):                   # static unroll -> static store idx
        tok = ids_ref[tile, t]                     # cheap SMEM scalar read
        g = jnp.right_shift(tok, lg)               # row group (leading, untiled dim)
        r = jnp.bitwise_and(tok, group - 1)        # sublane within the group
        rows = table_ref[g]                        # (group, E_pad) load, dyn leading idx
        row = jnp.where(sub_iota == r, rows, 0).sum(axis=0, keepdims=True)
        out_ref[pl.ds(t, 1), :] = row.astype(out_ref.dtype)


# ---------------------------------------------------------------------------
# Path 2: table stays in HBM, per-row DMA gather with a semaphore ring.
# ---------------------------------------------------------------------------
def _gather_hbm_kernel(ids_ref, table_hbm, out_ref, sems, *,
                       tile_tokens, ring, n_tokens, padding_idx):
    """ids_ref:   (n_tiles, tile_tokens) int32 in SMEM (scalar prefetch)
    table_hbm: (V, E) table left in HBM (memory_space=pl.ANY)
    out_ref:   (tile_tokens, E) output block in VMEM
    sems:      (ring,) DMA completion semaphores (reused across batches)
    """
    tile = pl.program_id(0)
    base = tile * tile_tokens
    e = out_ref.shape[-1]

    def row_copy(t, tok, slot):
        return pltpu.make_async_copy(
            table_hbm.at[pl.ds(tok, 1)],           # (1, E) row in HBM
            out_ref.at[pl.ds(t, 1)],               # (1, E) row of the output block
            sems.at[slot],
        )

    # Static unroll in ring-sized batches: issue `ring` row DMAs, wait them,
    # then reuse the same semaphores.  Static `t` keeps stores statically
    # indexed; predicates are identical between issue and wait.
    for g0 in range(0, tile_tokens, ring):
        nr = min(ring, tile_tokens - g0)

        for s in range(nr):                        # --- issue batch ---
            t = g0 + s
            tok = ids_ref[tile, t]
            in_range = (base + t) < n_tokens       # last-tile guard
            is_pad = tok == padding_idx

            @pl.when(jnp.logical_and(in_range, jnp.logical_not(is_pad)))
            def _issue(t=t, tok=tok, s=s):
                row_copy(t, tok, s).start()

            # padding_idx rows become the zero vector directly (no HBM read).
            @pl.when(jnp.logical_and(in_range, is_pad))
            def _zero(t=t):
                out_ref[pl.ds(t, 1), :] = jnp.zeros((1, e), out_ref.dtype)

        for s in range(nr):                        # --- wait batch ---
            t = g0 + s
            tok = ids_ref[tile, t]
            in_range = (base + t) < n_tokens
            is_pad = tok == padding_idx

            @pl.when(jnp.logical_and(in_range, jnp.logical_not(is_pad)))
            def _wait(t=t, tok=tok, s=s):
                row_copy(t, tok, s).wait()


# ---------------------------------------------------------------------------
# Wrapper
# ---------------------------------------------------------------------------
def _vmem_capacity_bytes():
    try:
        return int(pltpu.get_tpu_info().vmem_capacity_bytes)
    except Exception:
        return 64 * 1024 * 1024        # v7x per-TensorCore VMEM (conservative floor)


def embedding_forward(x, table, padding_idx=None, *, tile_tokens=None,
                      force_path=None):
    """x: (B, S) integer ids; table: (V, E) float -> (B, S, E)."""
    B, S = x.shape
    V, E = table.shape
    N = B * S
    itemsize = jnp.dtype(table.dtype).itemsize

    # ---- choose gather path from table size vs this chip's VMEM capacity ----
    group = {4: 8, 2: 16, 1: 32}.get(itemsize, 8)  # one sublane tile of rows
    e_pad = 128 * pl.cdiv(E, 128)                  # lane-dense embedding dim
    v_pad = group * pl.cdiv(V, group)
    vmem_cap = _vmem_capacity_bytes()
    # Conservative: assume the grid-invariant table block may still be double
    # buffered by the pipeline, plus double-buffered output blocks + headroom.
    resident_need = (2 * v_pad * e_pad * itemsize
                     + 4 * 256 * e_pad * itemsize + (2 << 20))
    use_resident = resident_need <= int(vmem_cap * 0.85)
    if force_path == "resident":
        use_resident = True
    elif force_path == "hbm":
        use_resident = False

    # ---- tile the flattened tokens ----
    max_tile = 256 if use_resident else 128        # big tiles amortize ~0.35us/step
    if tile_tokens is None:
        tile_tokens = min(max_tile, 8 * pl.cdiv(max(N, 1), 8))
    tile_tokens = max(8, 8 * pl.cdiv(tile_tokens, 8))
    n_tiles = pl.cdiv(N, tile_tokens)
    n_tok_pad = n_tiles * tile_tokens

    ids = x.reshape(N).astype(jnp.int32)
    # nn.Embedding raises on out-of-range ids; the TPU gather has no bounds
    # check, so clamp to keep an invalid id from reading arbitrary memory.
    # TODO(synk): surface invalid ids (debug_check) instead of silently clamping.
    ids = jnp.clip(ids, 0, V - 1)
    if n_tok_pad != N:
        ids = jnp.pad(ids, (0, n_tok_pad - N))
    # 2-D SMEM layout avoids the 1-D next-power-of-2 SMEM padding blowup.
    # TODO(synk): for very large B*S (>~256K tokens) switch ids to a per-tile
    # SMEM-blocked input instead of whole-array scalar prefetch.
    ids2d = ids.reshape(n_tiles, tile_tokens)

    pad_idx = -1 if padding_idx is None else int(padding_idx)

    if use_resident:
        tbl = table
        if e_pad != E or v_pad != V:
            tbl = jnp.pad(tbl, ((0, v_pad - V), (0, e_pad - E)))
        tbl = tbl.reshape(v_pad // group, group, e_pad)
        vmem_limit = min(int(vmem_cap * 0.9),
                         max(resident_need + (4 << 20), 16 << 20))

        kernel = functools.partial(_gather_resident_kernel,
                                   tile_tokens=tile_tokens, group=group)
        out_flat = pl.pallas_call(
            kernel,
            out_shape=jax.ShapeDtypeStruct((n_tok_pad, e_pad), table.dtype),
            grid_spec=pltpu.PrefetchScalarGridSpec(
                num_scalar_prefetch=1,                     # ids -> SMEM
                grid=(n_tiles,),
                in_specs=[
                    # Whole table, constant block index -> fetched once per
                    # core and kept resident in VMEM across all token tiles.
                    pl.BlockSpec((v_pad // group, group, e_pad),
                                 lambda i, _ids: (0, 0, 0)),
                ],
                out_specs=pl.BlockSpec((tile_tokens, e_pad),
                                       lambda i, _ids: (i, 0)),
            ),
            compiler_params=pltpu.CompilerParams(
                dimension_semantics=("parallel",),         # token tiles across TCs
                vmem_limit_bytes=vmem_limit,
            ),
        )(ids2d, tbl)
        out_flat = out_flat[:N, :E]
    else:
        ring = min(16, tile_tokens)
        kernel = functools.partial(_gather_hbm_kernel, tile_tokens=tile_tokens,
                                   ring=ring, n_tokens=N, padding_idx=pad_idx)
        out_flat = pl.pallas_call(
            kernel,
            out_shape=jax.ShapeDtypeStruct((n_tok_pad, E), table.dtype),
            grid_spec=pltpu.PrefetchScalarGridSpec(
                num_scalar_prefetch=1,                     # ids -> SMEM
                grid=(n_tiles,),
                in_specs=[pl.BlockSpec(memory_space=pl.ANY)],  # table stays in HBM
                out_specs=pl.BlockSpec((tile_tokens, E),
                                       lambda i, _ids: (i, 0)),
                scratch_shapes=[pltpu.SemaphoreType.DMA((ring,))],
            ),
            compiler_params=pltpu.CompilerParams(
                dimension_semantics=("parallel",),
            ),
        )(ids2d, table)
        out_flat = out_flat[:N]

    return out_flat.reshape(B, S, E)


class EmbeddingLayerPallas:
    """Mirrors models.EmbeddingLayer: nn.Embedding(vocab, emb, padding_idx)."""

    def __init__(self, vocab_size, embedding_size, padding_idx=2, key=None):
        self.vocab_size = vocab_size
        self.embedding_size = embedding_size
        self.padding_idx = padding_idx
        if key is None:
            key = jax.random.PRNGKey(0)
        # nn.Embedding default init: N(0, 1), with the padding_idx row zeroed.
        w = jax.random.normal(key, (vocab_size, embedding_size), dtype=jnp.float32)
        if padding_idx is not None:
            w = w.at[padding_idx].set(0.0)
        self.weight = w
        # TODO(synk): padding_idx "no gradient" behavior is a training-time
        # property of nn.Embedding, not represented in this forward-only kernel.

    def __call__(self, x, *, force_path=None):
        return embedding_forward(x, self.weight, self.padding_idx,
                                 force_path=force_path)


if __name__ == "__main__":
    # Small shapes consistent with the module: batch=2, seq=8, vocab=64, emb=128
    vocab_size, embedding_size = 64, 128
    batch, seq = 2, 8
    padding_idx = 2

    key = jax.random.PRNGKey(0)
    k_ids, k_w = jax.random.split(key)

    layer = EmbeddingLayerPallas(vocab_size, embedding_size, padding_idx, key=k_w)

    x = jax.random.randint(k_ids, (batch, seq), 0, vocab_size, dtype=jnp.int32)
    # make sure padding_idx appears so the zero-row path is exercised
    x = x.at[0, 3].set(padding_idx)
    x = x.at[1, 0].set(padding_idx)

    ref = jnp.take(layer.weight, x, axis=0)

    # Resident-table (VMEM) fast path -- selected automatically for this size.
    out = jax.block_until_ready(layer(x))
    assert out.shape == (batch, seq, embedding_size)
    assert jnp.allclose(out, ref, atol=1e-6), "resident path mismatch vs reference"
    assert jnp.allclose(out[0, 3], 0.0) and jnp.allclose(out[1, 0], 0.0)

    # HBM row-DMA fallback path (used when the table exceeds the VMEM budget).
    out_hbm = jax.block_until_ready(layer(x, force_path="hbm"))
    assert jnp.allclose(out_hbm, ref, atol=1e-6), "hbm path mismatch vs reference"

    print("KERNEL_OK")
</pallas_src>

<mosaic_0001>
module attributes {stable_mosaic.version = 11 : i64} {
  func.func @_gather_resident_kernel(%arg0: i32, %arg1: memref<1x16xi32, #tpu.memory_space<smem>>, %arg2: memref<8x8x128xf32, #tpu.memory_space<vmem>>, %arg3: memref<16x128xf32, #tpu.memory_space<vmem>>) attributes {dimension_semantics = [#tpu.dimension_semantics<parallel>], iteration_bounds = array<i64: 1>, scalar_prefetch = 1 : i64, scratch_operands = 0 : i64, tpu.core_type = #tpu.core_type<tc>, window_params = [{pipeline_mode = #tpu.pipeline_mode<synchronous>, transform_indices = @transform_0, window_bounds = array<i64: 8, 8, 128>}, {transform_indices = @transform_1, window_bounds = array<i64: 16, 128>}]} {
    %0 = tpu.iota {dimensions = array<i32: 0>} : vector<8x128xi32>
    %1 = arith.index_cast %arg0 : i32 to index
    %c0 = arith.constant 0 : index
    %2 = memref.load %arg1[%1, %c0] : memref<1x16xi32, #tpu.memory_space<smem>>
    %c3_i32 = arith.constant 3 : i32
    %3 = arith.shrsi %2, %c3_i32 : i32
    %c7_i32 = arith.constant 7 : i32
    %4 = arith.andi %2, %c7_i32 : i32
    %5 = arith.index_cast %3 : i32 to index
    %c0_0 = arith.constant 0 : index
    %c0_1 = arith.constant 0 : index
    %6 = vector.load %arg2[%5, %c0_0, %c0_1] : memref<8x8x128xf32, #tpu.memory_space<vmem>>, vector<1x8x128xf32>
    %7 = vector.shape_cast %6 : vector<1x8x128xf32> to vector<8x128xf32>
    %8 = vector.broadcast %4 : i32 to vector<8x128xi32>
    %9 = arith.cmpi eq, %0, %8 : vector<8x128xi32>
    %c0_i32 = arith.constant 0 : i32
    %10 = arith.sitofp %c0_i32 : i32 to f32
    %11 = vector.broadcast %10 : f32 to vector<8x128xf32>
    %12 = arith.select %9, %7, %11 : vector<8x128xi1>, vector<8x128xf32>
    %cst = arith.constant dense<0.000000e+00> : vector<128xf32>
    %13 = vector.multi_reduction <add>, %12, %cst [0] : vector<8x128xf32> to vector<128xf32>
    %14 = vector.shape_cast %13 : vector<128xf32> to vector<1x128xf32>
    %c0_2 = arith.constant 0 : index
    %c0_3 = arith.constant 0 : index
    %15 = vector.load %arg3[%c0_2, %c0_3] : memref<16x128xf32, #tpu.memory_space<vmem>>, vector<1x128xf32>
    tpu.vector_store %arg3[%c0_2, %c0_3], %14 {strides = array<i32>} : memref<16x128xf32, #tpu.memory_space<vmem>>, vector<1x128xf32>,
    %16 = arith.index_cast %arg0 : i32 to index
    %c1 = arith.constant 1 : index
    %17 = memref.load %arg1[%16, %c1] : memref<1x16xi32, #tpu.memory_space<smem>>
    %c3_i32_4 = arith.constant 3 : i32
    %18 = arith.shrsi %17, %c3_i32_4 : i32
    %c7_i32_5 = arith.constant 7 : i32
    %19 = arith.andi %17, %c7_i32_5 : i32
    %20 = arith.index_cast %18 : i32 to index
    %c0_6 = arith.constant 0 : index
    %c0_7 = arith.constant 0 : index
    %21 = vector.load %arg2[%20, %c0_6, %c0_7] : memref<8x8x128xf32, #tpu.memory_space<vmem>>, vector<1x8x128xf32>
    %22 = vector.shape_cast %21 : vector<1x8x128xf32> to vector<8x128xf32>
    %23 = vector.broadcast %19 : i32 to vector<8x128xi32>
    %24 = arith.cmpi eq, %0, %23 : vector<8x128xi32>
    %c0_i32_8 = arith.constant 0 : i32
    %25 = arith.sitofp %c0_i32_8 : i32 to f32
    %26 = vector.broadcast %25 : f32 to vector<8x128xf32>
    %27 = arith.select %24, %22, %26 : vector<8x128xi1>, vector<8x128xf32>
    %cst_9 = arith.constant dense<0.000000e+00> : vector<128xf32>
    %28 = vector.multi_reduction <add>, %27, %cst_9 [0] : vector<8x128xf32> to vector<128xf32>
    %29 = vector.shape_cast %28 : vector<128xf32> to vector<1x128xf32>
    %c1_10 = arith.constant 1 : index
    %c0_11 = arith.constant 0 : index
    %30 = vector.load %arg3[%c1_10, %c0_11] : memref<16x128xf32, #tpu.memory_space<vmem>>, vector<1x128xf32>
    tpu.vector_store %arg3[%c1_10, %c0_11], %29 {strides = array<i32>} : memref<16x128xf32, #tpu.memory_space<vmem>>, vector<1x128xf32>,
    %31 = arith.index_cast %arg0 : i32 to index
    %c2 = arith.constant 2 : index
    %32 = memref.load %arg1[%31, %c2] : memref<1x16xi32, #tpu.memory_space<smem>>
    %c3_i32_12 = arith.constant 3 : i32
    %33 = arith.shrsi %32, %c3_i32_12 : i32
    %c7_i32_13 = arith.constant 7 : i32
    %34 = arith.andi %32, %c7_i32_13 : i32
    %35 = arith.index_cast %33 : i32 to index
    %c0_14 = arith.constant 0 : index
    %c0_15 = arith.constant 0 : index
    %36 = vector.load %arg2[%35, %c0_14, %c0_15] : memref<8x8x128xf32, #tpu.memory_space<vmem>>, vector<1x8x128xf32>
    %37 = vector.shape_cast %36 : vector<1x8x128xf32> to vector<8x128xf32>
    %38 = vector.broadcast %34 : i32 to vector<8x128xi32>
    %39 = arith.cmpi eq, %0, %38 : vector<8x128xi32>
    %c0_i32_16 = arith.constant 0 : i32
    %40 = arith.sitofp %c0_i32_16 : i32 to f32
    %41 = vector.broadcast %40 : f32 to vector<8x128xf32>
    %42 = arith.select %39, %37, %41 : vector<8x128xi1>, vector<8x128xf32>
    %cst_17 = arith.constant dense<0.000000e+00> : vector<128xf32>
    %43 = vector.multi_reduction <add>, %42, %cst_17 [0] : vector<8x128xf32> to vector<128xf32>
    %44 = vector.shape_cast %43 : vector<128xf32> to vector<1x128xf32>
    %c2_18 = arith.constant 2 : index
    %c0_19 = arith.constant 0 : index
    %45 = vector.load %arg3[%c2_18, %c0_19] : memref<16x128xf32, #tpu.memory_space<vmem>>, vector<1x128xf32>
    tpu.vector_store %arg3[%c2_18, %c0_19], %44 {strides = array<i32>} : memref<16x128xf32, #tpu.memory_space<vmem>>, vector<1x128xf32>,
    %46 = arith.index_cast %arg0 : i32 to index
    %c3 = arith.constant 3 : index
    %47 = memref.load %arg1[%46, %c3] : memref<1x16xi32, #tpu.memory_space<smem>>
    %c3_i32_20 = arith.constant 3 : i32
    %48 = arith.shrsi %47, %c3_i32_20 : i32
    %c7_i32_21 = arith.constant 7 : i32
    %49 = arith.andi %47, %c7_i32_21 : i32
    %50 = arith.index_cast %48 : i32 to index
    %c0_22 = arith.constant 0 : index
    %c0_23 = arith.constant 0 : index
    %51 = vector.load %arg2[%50, %c0_22, %c0_23] : memref<8x8x128xf32, #tpu.memory_space<vmem>>, vector<1x8x128xf32>
    %52 = vector.shape_cast %51 : vector<1x8x128xf32> to vector<8x128xf32>
    %53 = vector.broadcast %49 : i32 to vector<8x128xi32>
    %54 = arith.cmpi eq, %0, %53 : vector<8x128xi32>
    %c0_i32_24 = arith.constant 0 : i32
    %55 = arith.sitofp %c0_i32_24 : i32 to f32
    %56 = vector.broadcast %55 : f32 to vector<8x128xf32>
    %57 = arith.select %54, %52, %56 : vector<8x128xi1>, vector<8x128xf32>
    %cst_25 = arith.constant dense<0.000000e+00> : vector<128xf32>
    %58 = vector.multi_reduction <add>, %57, %cst_25 [0] : vector<8x128xf32> to vector<128xf32>
    %59 = vector.shape_cast %58 : vector<128xf32> to vector<1x128xf32>
    %c3_26 = arith.constant 3 : index
    %c0_27 = arith.constant 0 : index
    %60 = vector.load %arg3[%c3_26, %c0_27] : memref<16x128xf32, #tpu.memory_space<vmem>>, vector<1x128xf32>
    tpu.vector_store %arg3[%c3_26, %c0_27], %59 {strides = array<i32>} : memref<16x128xf32, #tpu.memory_space<vmem>>, vector<1x128xf32>,
    %61 = arith.index_cast %arg0 : i32 to index
    %c4 = arith.constant 4 : index
    %62 = memref.load %arg1[%61, %c4] : memref<1x16xi32, #tpu.memory_space<smem>>
    %c3_i32_28 = arith.constant 3 : i32
    %63 = arith.shrsi %62, %c3_i32_28 : i32
    %c7_i32_29 = arith.constant 7 : i32
    %64 = arith.andi %62, %c7_i32_29 : i32
    %65 = arith.index_cast %63 : i32 to index
    %c0_30 = arith.constant 0 : index
    %c0_31 = arith.constant 0 : index
    %66 = vector.load %arg2[%65, %c0_30, %c0_31] : memref<8x8x128xf32, #tpu.memory_space<vmem>>, vector<1x8x128xf32>
    %67 = vector.shape_cast %66 : vector<1x8x128xf32> to vector<8x128xf32>
    %68 = vector.broadcast %64 : i32 to vector<8x128xi32>
    %69 = arith.cmpi eq, %0, %68 : vector<8x128xi32>
    %c0_i32_32 = arith.constant 0 : i32
    %70 = arith.sitofp %c0_i32_32 : i32 to f32
    %71 = vector.broadcast %70 : f32 to vector<8x128xf32>
    %72 = arith.select %69, %67, %71 : vector<8x128xi1>, vector<8x128xf32>
    %cst_33 = arith.constant dense<0.000000e+00> : vector<128xf32>
    %73 = vector.multi_reduction <add>, %72, %cst_33 [0] : vector<8x128xf32> to vector<128xf32>
    %74 = vector.shape_cast %73 : vector<128xf32> to vector<1x128xf32>
    %c4_34 = arith.constant 4 : index
    %c0_35 = arith.constant 0 : index
    %75 = vector.load %arg3[%c4_34, %c0_35] : memref<16x128xf32, #tpu.memory_space<vmem>>, vector<1x128xf32>
    tpu.vector_store %arg3[%c4_34, %c0_35], %74 {strides = array<i32>} : memref<16x128xf32, #tpu.memory_space<vmem>>, vector<1x128xf32>,
    %76 = arith.index_cast %arg0 : i32 to index
    %c5 = arith.constant 5 : index
    %77 = memref.load %arg1[%76, %c5] : memref<1x16xi32, #tpu.memory_space<smem>>
    %c3_i32_36 = arith.constant 3 : i32
    %78 = arith.shrsi %77, %c3_i32_36 : i32
    %c7_i32_37 = arith.constant 7 : i32
    %79 = arith.andi %77, %c7_i32_37 : i32
    %80 = arith.index_cast %78 : i32 to index
    %c0_38 = arith.constant 0 : index
    %c0_39 = arith.constant 0 : index
    %81 = vector.load %arg2[%80, %c0_38, %c0_39] : memref<8x8x128xf32, #tpu.memory_space<vmem>>, vector<1x8x128xf32>
    %82 = vector.shape_cast %81 : vector<1x8x128xf32> to vector<8x128xf32>
    %83 = vector.broadcast %79 : i32 to vector<8x128xi32>
    %84 = arith.cmpi eq, %0, %83 : vector<8x128xi32>
    %c0_i32_40 = arith.constant 0 : i32
    %85 = arith.sitofp %c0_i32_40 : i32 to f32
    %86 = vector.broadcast %85 : f32 to vector<8x128xf32>
    %87 = arith.select %84, %82, %86 : vector<8x128xi1>, vector<8x128xf32>
    %cst_41 = arith.constant dense<0.000000e+00> : vector<128xf32>
    %88 = vector.multi_reduction <add>, %87, %cst_41 [0] : vector<8x128xf32> to vector<128xf32>
    %89 = vector.shape_cast %88 : vector<128xf32> to vector<1x128xf32>
    %c5_42 = arith.constant 5 : index
    %c0_43 = arith.constant 0 : index
    %90 = vector.load %arg3[%c5_42, %c0_43] : memref<16x128xf32, #tpu.memory_space<vmem>>, vector<1x128xf32>
    tpu.vector_store %arg3[%c5_42, %c0_43], %89 {strides = array<i32>} : memref<16x128xf32, #tpu.memory_space<vmem>>, vector<1x128xf32>,
    %91 = arith.index_cast %arg0 : i32 to index
    %c6 = arith.constant 6 : index
    %92 = memref.load %arg1[%91, %c6] : memref<1x16xi32, #tpu.memory_space<smem>>
    %c3_i32_44 = arith.constant 3 : i32
    %93 = arith.shrsi %92, %c3_i32_44 : i32
    %c7_i32_45 = arith.constant 7 : i32
    %94 = arith.andi %92, %c7_i32_45 : i32
    %95 = arith.index_cast %93 : i32 to index
    %c0_46 = arith.constant 0 : index
    %c0_47 = arith.constant 0 : index
    %96 = vector.load %arg2[%95, %c0_46, %c0_47] : memref<8x8x128xf32, #tpu.memory_space<vmem>>, vector<1x8x128xf32>
    %97 = vector.shape_cast %96 : vector<1x8x128xf32> to vector<8x128xf32>
    %98 = vector.broadcast %94 : i32 to vector<8x128xi32>
    %99 = arith.cmpi eq, %0, %98 : vector<8x128xi32>
    %c0_i32_48 = arith.constant 0 : i32
    %100 = arith.sitofp %c0_i32_48 : i32 to f32
    %101 = vector.broadcast %100 : f32 to vector<8x128xf32>
    %102 = arith.select %99, %97, %101 : vector<8x128xi1>, vector<8x128xf32>
    %cst_49 = arith.constant dense<0.000000e+00> : vector<128xf32>
    %103 = vector.multi_reduction <add>, %102, %cst_49 [0] : vector<8x128xf32> to vector<128xf32>
    %104 = vector.shape_cast %103 : vector<128xf32> to vector<1x128xf32>
    %c6_50 = arith.constant 6 : index
    %c0_51 = arith.constant 0 : index
    %105 = vector.load %arg3[%c6_50, %c0_51] : memref<16x128xf32, #tpu.memory_space<vmem>>, vector<1x128xf32>
    tpu.vector_store %arg3[%c6_50, %c0_51], %104 {strides = array<i32>} : memref<16x128xf32, #tpu.memory_space<vmem>>, vector<1x128xf32>,
    %106 = arith.index_cast %arg0 : i32 to index
    %c7 = arith.constant 7 : index
    %107 = memref.load %arg1[%106, %c7] : memref<1x16xi32, #tpu.memory_space<smem>>
    %c3_i32_52 = arith.constant 3 : i32
    %108 = arith.shrsi %107, %c3_i32_52 : i32
    %c7_i32_53 = arith.constant 7 : i32
    %109 = arith.andi %107, %c7_i32_53 : i32
    %110 = arith.index_cast %108 : i32 to index
    %c0_54 = arith.constant 0 : index
    %c0_55 = arith.constant 0 : index
    %111 = vector.load %arg2[%110, %c0_54, %c0_55] : memref<8x8x128xf32, #tpu.memory_space<vmem>>, vector<1x8x128xf32>
    %112 = vector.shape_cast %111 : vector<1x8x128xf32> to vector<8x128xf32>
    %113 = vector.broadcast %109 : i32 to vector<8x128xi32>
    %114 = arith.cmpi eq, %0, %113 : vector<8x128xi32>
    %c0_i32_56 = arith.constant 0 : i32
    %115 = arith.sitofp %c0_i32_56 : i32 to f32
    %116 = vector.broadcast %115 : f32 to vector<8x128xf32>
    %117 = arith.select %114, %112, %116 : vector<8x128xi1>, vector<8x128xf32>
    %cst_57 = arith.constant dense<0.000000e+00> : vector<128xf32>
    %118 = vector.multi_reduction <add>, %117, %cst_57 [0] : vector<8x128xf32> to vector<128xf32>
    %119 = vector.shape_cast %118 : vector<128xf32> to vector<1x128xf32>
    %c7_58 = arith.constant 7 : index
    %c0_59 = arith.constant 0 : index
    %120 = vector.load %arg3[%c7_58, %c0_59] : memref<16x128xf32, #tpu.memory_space<vmem>>, vector<1x128xf32>
    tpu.vector_store %arg3[%c7_58, %c0_59], %119 {strides = array<i32>} : memref<16x128xf32, #tpu.memory_space<vmem>>, vector<1x128xf32>,
    %121 = arith.index_cast %arg0 : i32 to index
    %c8 = arith.constant 8 : index
    %122 = memref.load %arg1[%121, %c8] : memref<1x16xi32, #tpu.memory_space<smem>>
    %c3_i32_60 = arith.constant 3 : i32
    %123 = arith.shrsi %122, %c3_i32_60 : i32
    %c7_i32_61 = arith.constant 7 : i32
    %124 = arith.andi %122, %c7_i32_61 : i32
    %125 = arith.index_cast %123 : i32 to index
    %c0_62 = arith.constant 0 : index
    %c0_63 = arith.constant 0 : index
    %126 = vector.load %arg2[%125, %c0_62, %c0_63] : memref<8x8x128xf32, #tpu.memory_space<vmem>>, vector<1x8x128xf32>
    %127 = vector.shape_cast %126 : vector<1x8x128xf32> to vector<8x128xf32>
    %128 = vector.broadcast %124 : i32 to vector<8x128xi32>
    %129 = arith.cmpi eq, %0, %128 : vector<8x128xi32>
    %c0_i32_64 = arith.constant 0 : i32
    %130 = arith.sitofp %c0_i32_64 : i32 to f32
    %131 = vector.broadcast %130 : f32 to vector<8x128xf32>
    %132 = arith.select %129, %127, %131 : vector<8x128xi1>, vector<8x128xf32>
    %cst_65 = arith.constant dense<0.000000e+00> : vector<128xf32>
    %133 = vector.multi_reduction <add>, %132, %cst_65 [0] : vector<8x128xf32> to vector<128xf32>
    %134 = vector.shape_cast %133 : vector<128xf32> to vector<1x128xf32>
    %c8_66 = arith.constant 8 : index
    %c0_67 = arith.constant 0 : index
    %135 = vector.load %arg3[%c8_66, %c0_67] : memref<16x128xf32, #tpu.memory_space<vmem>>, vector<1x128xf32>
    tpu.vector_store %arg3[%c8_66, %c0_67], %134 {strides = array<i32>} : memref<16x128xf32, #tpu.memory_space<vmem>>, vector<1x128xf32>,
    %136 = arith.index_cast %arg0 : i32 to index
    %c9 = arith.constant 9 : index
    %137 = memref.load %arg1[%136, %c9] : memref<1x16xi32, #tpu.memory_space<smem>>
    %c3_i32_68 = arith.constant 3 : i32
    %138 = arith.shrsi %137, %c3_i32_68 : i32
    %c7_i32_69 = arith.constant 7 : i32
    %139 = arith.andi %137, %c7_i32_69 : i32
    %140 = arith.index_cast %138 : i32 to index
    %c0_70 = arith.constant 0 : index
    %c0_71 = arith.constant 0 : index
    %141 = vector.load %arg2[%140, %c0_70, %c0_71] : memref<8x8x128xf32, #tpu.memory_space<vmem>>, vector<1x8x128xf32>
    %142 = vector.shape_cast %141 : vector<1x8x128xf32> to vector<8x128xf32>
    %143 = vector.broadcast %139 : i32 to vector<8x128xi32>
    %144 = arith.cmpi eq, %0, %143 : vector<8x128xi32>
    %c0_i32_72 = arith.constant 0 : i32
    %145 = arith.sitofp %c0_i32_72 : i32 to f32
    %146 = vector.broadcast %145 : f32 to vector<8x128xf32>
    %147 = arith.select %144, %142, %146 : vector<8x128xi1>, vector<8x128xf32>
    %cst_73 = arith.constant dense<0.000000e+00> : vector<128xf32>
    %148 = vector.multi_reduction <add>, %147, %cst_73 [0] : vector<8x128xf32> to vector<128xf32>
    %149 = vector.shape_cast %148 : vector<128xf32> to vector<1x128xf32>
    %c9_74 = arith.constant 9 : index
    %c0_75 = arith.constant 0 : index
    %150 = vector.load %arg3[%c9_74, %c0_75] : memref<16x128xf32, #tpu.memory_space<vmem>>, vector<1x128xf32>
    tpu.vector_store %arg3[%c9_74, %c0_75], %149 {strides = array<i32>} : memref<16x128xf32, #tpu.memory_space<vmem>>, vector<1x128xf32>,
    %151 = arith.index_cast %arg0 : i32 to index
    %c10 = arith.constant 10 : index
    %152 = memref.load %arg1[%151, %c10] : memref<1x16xi32, #tpu.memory_space<smem>>
    %c3_i32_76 = arith.constant 3 : i32
    %153 = arith.shrsi %152, %c3_i32_76 : i32
    %c7_i32_77 = arith.constant 7 : i32
    %154 = arith.andi %152, %c7_i32_77 : i32
    %155 = arith.index_cast %153 : i32 to index
    %c0_78 = arith.constant 0 : index
    %c0_79 = arith.constant 0 : index
    %156 = vector.load %arg2[%155, %c0_78, %c0_79] : memref<8x8x128xf32, #tpu.memory_space<vmem>>, vector<1x8x128xf32>
    %157 = vector.shape_cast %156 : vector<1x8x128xf32> to vector<8x128xf32>
    %158 = vector.broadcast %154 : i32 to vector<8x128xi32>
    %159 = arith.cmpi eq, %0, %158 : vector<8x128xi32>
    %c0_i32_80 = arith.constant 0 : i32
    %160 = arith.sitofp %c0_i32_80 : i32 to f32
    %161 = vector.broadcast %160 : f32 to vector<8x128xf32>
    %162 = arith.select %159, %157, %161 : vector<8x128xi1>, vector<8x128xf32>
    %cst_81 = arith.constant dense<0.000000e+00> : vector<128xf32>
    %163 = vector.multi_reduction <add>, %162, %cst_81 [0] : vector<8x128xf32> to vector<128xf32>
    %164 = vector.shape_cast %163 : vector<128xf32> to vector<1x128xf32>
    %c10_82 = arith.constant 10 : index
    %c0_83 = arith.constant 0 : index
    %165 = vector.load %arg3[%c10_82, %c0_83] : memref<16x128xf32, #tpu.memory_space<vmem>>, vector<1x128xf32>
    tpu.vector_store %arg3[%c10_82, %c0_83], %164 {strides = array<i32>} : memref<16x128xf32, #tpu.memory_space<vmem>>, vector<1x128xf32>,
    %166 = arith.index_cast %arg0 : i32 to index
    %c11 = arith.constant 11 : index
    %167 = memref.load %arg1[%166, %c11] : memref<1x16xi32, #tpu.memory_space<smem>>
    %c3_i32_84 = arith.constant 3 : i32
    %168 = arith.shrsi %167, %c3_i32_84 : i32
    %c7_i32_85 = arith.constant 7 : i32
    %169 = arith.andi %167, %c7_i32_85 : i32
    %170 = arith.index_cast %168 : i32 to index
    %c0_86 = arith.constant 0 : index
    %c0_87 = arith.constant 0 : index
    %171 = vector.load %arg2[%170, %c0_86, %c0_87] : memref<8x8x128xf32, #tpu.memory_space<vmem>>, vector<1x8x128xf32>
    %172 = vector.shape_cast %171 : vector<1x8x128xf32> to vector<8x128xf32>
    %173 = vector.broadcast %169 : i32 to vector<8x128xi32>
    %174 = arith.cmpi eq, %0, %173 : vector<8x128xi32>
    %c0_i32_88 = arith.constant 0 : i32
    %175 = arith.sitofp %c0_i32_88 : i32 to f32
    %176 = vector.broadcast %175 : f32 to vector<8x128xf32>
    %177 = arith.select %174, %172, %176 : vector<8x128xi1>, vector<8x128xf32>
    %cst_89 = arith.constant dense<0.000000e+00> : vector<128xf32>
    %178 = vector.multi_reduction <add>, %177, %cst_89 [0] : vector<8x128xf32> to vector<128xf32>
    %179 = vector.shape_cast %178 : vector<128xf32> to vector<1x128xf32>
    %c11_90 = arith.constant 11 : index
    %c0_91 = arith.constant 0 : index
    %180 = vector.load %arg3[%c11_90, %c0_91] : memref<16x128xf32, #tpu.memory_space<vmem>>, vector<1x128xf32>
    tpu.vector_store %arg3[%c11_90, %c0_91], %179 {strides = array<i32>} : memref<16x128xf32, #tpu.memory_space<vmem>>, vector<1x128xf32>,
    %181 = arith.index_cast %arg0 : i32 to index
    %c12 = arith.constant 12 : index
    %182 = memref.load %arg1[%181, %c12] : memref<1x16xi32, #tpu.memory_space<smem>>
    %c3_i32_92 = arith.constant 3 : i32
    %183 = arith.shrsi %182, %c3_i32_92 : i32
    %c7_i32_93 = arith.constant 7 : i32
    %184 = arith.andi %182, %c7_i32_93 : i32
    %185 = arith.index_cast %183 : i32 to index
    %c0_94 = arith.constant 0 : index
    %c0_95 = arith.constant 0 : index
    %186 = vector.load %arg2[%185, %c0_94, %c0_95] : memref<8x8x128xf32, #tpu.memory_space<vmem>>, vector<1x8x128xf32>
    %187 = vector.shape_cast %186 : vector<1x8x128xf32> to vector<8x128xf32>
    %188 = vector.broadcast %184 : i32 to vector<8x128xi32>
    %189 = arith.cmpi eq, %0, %188 : vector<8x128xi32>
    %c0_i32_96 = arith.constant 0 : i32
    %190 = arith.sitofp %c0_i32_96 : i32 to f32
    %191 = vector.broadcast %190 : f32 to vector<8x128xf32>
    %192 = arith.select %189, %187, %191 : vector<8x128xi1>, vector<8x128xf32>
    %cst_97 = arith.constant dense<0.000000e+00> : vector<128xf32>
    %193 = vector.multi_reduction <add>, %192, %cst_97 [0] : vector<8x128xf32> to vector<128xf32>
    %194 = vector.shape_cast %193 : vector<128xf32> to vector<1x128xf32>
    %c12_98 = arith.constant 12 : index
    %c0_99 = arith.constant 0 : index
    %195 = vector.load %arg3[%c12_98, %c0_99] : memref<16x128xf32, #tpu.memory_space<vmem>>, vector<1x128xf32>
    tpu.vector_store %arg3[%c12_98, %c0_99], %194 {strides = array<i32>} : memref<16x128xf32, #tpu.memory_space<vmem>>, vector<1x128xf32>,
    %196 = arith.index_cast %arg0 : i32 to index
    %c13 = arith.constant 13 : index
    %197 = memref.load %arg1[%196, %c13] : memref<1x16xi32, #tpu.memory_space<smem>>
    %c3_i32_100 = arith.constant 3 : i32
    %198 = arith.shrsi %197, %c3_i32_100 : i32
    %c7_i32_101 = arith.constant 7 : i32
    %199 = arith.andi %197, %c7_i32_101 : i32
    %200 = arith.index_cast %198 : i32 to index
    %c0_102 = arith.constant 0 : index
    %c0_103 = arith.constant 0 : index
    %201 = vector.load %arg2[%200, %c0_102, %c0_103] : memref<8x8x128xf32, #tpu.memory_space<vmem>>, vector<1x8x128xf32>
    %202 = vector.shape_cast %201 : vector<1x8x128xf32> to vector<8x128xf32>
    %203 = vector.broadcast %199 : i32 to vector<8x128xi32>
    %204 = arith.cmpi eq, %0, %203 : vector<8x128xi32>
    %c0_i32_104 = arith.constant 0 : i32
    %205 = arith.sitofp %c0_i32_104 : i32 to f32
    %206 = vector.broadcast %205 : f32 to vector<8x128xf32>
    %207 = arith.select %204, %202, %206 : vector<8x128xi1>, vector<8x128xf32>
    %cst_105 = arith.constant dense<0.000000e+00> : vector<128xf32>
    %208 = vector.multi_reduction <add>, %207, %cst_105 [0] : vector<8x128xf32> to vector<128xf32>
    %209 = vector.shape_cast %208 : vector<128xf32> to vector<1x128xf32>
    %c13_106 = arith.constant 13 : index
    %c0_107 = arith.constant 0 : index
    %210 = vector.load %arg3[%c13_106, %c0_107] : memref<16x128xf32, #tpu.memory_space<vmem>>, vector<1x128xf32>
    tpu.vector_store %arg3[%c13_106, %c0_107], %209 {strides = array<i32>} : memref<16x128xf32, #tpu.memory_space<vmem>>, vector<1x128xf32>,
    %211 = arith.index_cast %arg0 : i32 to index
    %c14 = arith.constant 14 : index
    %212 = memref.load %arg1[%211, %c14] : memref<1x16xi32, #tpu.memory_space<smem>>
    %c3_i32_108 = arith.constant 3 : i32
    %213 = arith.shrsi %212, %c3_i32_108 : i32
    %c7_i32_109 = arith.constant 7 : i32
    %214 = arith.andi %212, %c7_i32_109 : i32
    %215 = arith.index_cast %213 : i32 to index
    %c0_110 = arith.constant 0 : index
    %c0_111 = arith.constant 0 : index
    %216 = vector.load %arg2[%215, %c0_110, %c0_111] : memref<8x8x128xf32, #tpu.memory_space<vmem>>, vector<1x8x128xf32>
    %217 = vector.shape_cast %216 : vector<1x8x128xf32> to vector<8x128xf32>
    %218 = vector.broadcast %214 : i32 to vector<8x128xi32>
    %219 = arith.cmpi eq, %0, %218 : vector<8x128xi32>
    %c0_i32_112 = arith.constant 0 : i32
    %220 = arith.sitofp %c0_i32_112 : i32 to f32
    %221 = vector.broadcast %220 : f32 to vector<8x128xf32>
    %222 = arith.select %219, %217, %221 : vector<8x128xi1>, vector<8x128xf32>
    %cst_113 = arith.constant dense<0.000000e+00> : vector<128xf32>
    %223 = vector.multi_reduction <add>, %222, %cst_113 [0] : vector<8x128xf32> to vector<128xf32>
    %224 = vector.shape_cast %223 : vector<128xf32> to vector<1x128xf32>
    %c14_114 = arith.constant 14 : index
    %c0_115 = arith.constant 0 : index
    %225 = vector.load %arg3[%c14_114, %c0_115] : memref<16x128xf32, #tpu.memory_space<vmem>>, vector<1x128xf32>
    tpu.vector_store %arg3[%c14_114, %c0_115], %224 {strides = array<i32>} : memref<16x128xf32, #tpu.memory_space<vmem>>, vector<1x128xf32>,
    %226 = arith.index_cast %arg0 : i32 to index
    %c15 = arith.constant 15 : index
    %227 = memref.load %arg1[%226, %c15] : memref<1x16xi32, #tpu.memory_space<smem>>
    %c3_i32_116 = arith.constant 3 : i32
    %228 = arith.shrsi %227, %c3_i32_116 : i32
    %c7_i32_117 = arith.constant 7 : i32
    %229 = arith.andi %227, %c7_i32_117 : i32
    %230 = arith.index_cast %228 : i32 to index
    %c0_118 = arith.constant 0 : index
    %c0_119 = arith.constant 0 : index
    %231 = vector.load %arg2[%230, %c0_118, %c0_119] : memref<8x8x128xf32, #tpu.memory_space<vmem>>, vector<1x8x128xf32>
    %232 = vector.shape_cast %231 : vector<1x8x128xf32> to vector<8x128xf32>
    %233 = vector.broadcast %229 : i32 to vector<8x128xi32>
    %234 = arith.cmpi eq, %0, %233 : vector<8x128xi32>
    %c0_i32_120 = arith.constant 0 : i32
    %235 = arith.sitofp %c0_i32_120 : i32 to f32
    %236 = vector.broadcast %235 : f32 to vector<8x128xf32>
    %237 = arith.select %234, %232, %236 : vector<8x128xi1>, vector<8x128xf32>
    %cst_121 = arith.constant dense<0.000000e+00> : vector<128xf32>
    %238 = vector.multi_reduction <add>, %237, %cst_121 [0] : vector<8x128xf32> to vector<128xf32>
    %239 = vector.shape_cast %238 : vector<128xf32> to vector<1x128xf32>
    %c15_122 = arith.constant 15 : index
    %c0_123 = arith.constant 0 : index
    %240 = vector.load %arg3[%c15_122, %c0_123] : memref<16x128xf32, #tpu.memory_space<vmem>>, vector<1x128xf32>
    tpu.vector_store %arg3[%c15_122, %c0_123], %239 {strides = array<i32>} : memref<16x128xf32, #tpu.memory_space<vmem>>, vector<1x128xf32>,
    return
  }
  func.func @transform_0(%arg0: i32, %arg1: memref<1x16xi32, #tpu.memory_space<smem>>) -> (i32, i32, i32) {
    %c0_i32 = arith.constant 0 : i32
    %c0_i32_0 = arith.constant 0 : i32
    %c0_i32_1 = arith.constant 0 : i32
    %c0_i32_2 = arith.constant 0 : i32
    return %c0_i32, %c0_i32_0, %c0_i32_1 : i32, i32, i32
  }
  func.func @transform_1(%arg0: i32, %arg1: memref<1x16xi32, #tpu.memory_space<smem>>) -> (i32, i32) {
    %c0_i32 = arith.constant 0 : i32
    %c0_i32_0 = arith.constant 0 : i32
    return %arg0, %c0_i32 : i32, i32
  }
}

</mosaic_0001>

<bundles_post_ra>
// kernel: tpu_custom_call.1
= control target key start
LH: loop header
LB: loop body
LE: loop exit
PB: predicated region body
PF: predicated region fallthrough
CT: control target
= control target key end

     0   :  { %s583_s0 = inlined_call_operand.hbm [shape: s32[1,16], index: 0, kind: input, shape index: {}]   ;;  %s584_s1 = inlined_call_operand.hbm [shape: f32[8,8,128], index: 1, kind: input, shape index: {}]   ;;  %s585_s2 = inlined_call_operand.hbm [shape: f32[16,128], index: 2, kind: output, shape index: {}]  }
   0x1   :  { %s387_s11 = scalar_lea.hbm %s583_s0, 16 }
   0x2   :  { %p388_p0 = scmp.ne.s32.totalorder %s583_s0, %s387_s11  ;;  %p391_p1 = scmp.lt.u32.totalorder %s387_s11, %s583_s0 }
   0x4   :  { %p393_p2 = pnand %p391_p1, %p388_p0 }
   0x6   :  { %396 = shalt.err (!%p393_p2)  }
   0x7   :  { %s447_s16 = smov [#allocation3]  }
   0x8   :  { %8 = dma.hbm_to_smem %s583_s0, 16, %s447_s16, [#allocation2] }
   0x9   :  { %441 = dma.done.wait [#allocation2], 16 }
   0xa   :  { %442 = vsyncadd [#allocation2], 4294967280 }
   0xb   :  { %10 = sfence }
   0xc   :  { %11 = vsyncpa [#allocation5], 0 }
   0xd   :  { %12 = vsyncpa [#allocation6], 0  ;;  %s448_s19 = smov [#allocation4]   ;;  %s397_s23 = scalar_lea.hbm %s584_s1, 1024 }
   0xe   :  { %s18_s20 = sshll.u32 %s448_s19, 4  ;;  %p398_p3 = scmp.ne.s32.totalorder %s584_s1, %s397_s23  ;;  %s19_s20 = int_to_ptr.vmem [resolvable:$true] %s18_s20 }
   0xf   :  { %p401_p4 = scmp.lt.u32.totalorder %s397_s23, %s584_s1 }
  0x11   :  { %p403_p5 = pnand %p401_p4, %p398_p3 }
  0x13   :  { %406 = shalt.err (!%p403_p5)
}
  0x14   :  { %s407_s0 = scalar_lea.vmem %s19_s20, 1024  ;;  %p412_p7 = scmp.lt.s32.totalorder %s19_s20, %s19_s20 }
  0x15   :  { %p408_p6 = scmp.ne.s32.totalorder %s19_s20, %s407_s0  ;;  %p413_p8 = scmp.lt.s32.totalorder %s407_s0, %s407_s0 }
  0x17   :  { %p414_p9 = por %p413_p8, %p412_p7 }
  0x19   :  { %p415_p10 = pnand %p414_p9, %p408_p6 }
  0x1b   :  { %418 = shalt.err (!%p415_p10)
}
  0x1c   :  { %s449_s28 = smov 128   ;;  %s450_s29 = smov 8  }
  0x1d   :  { %24 = dma.hbm_to_vmem [thread:$0]  %s584_s1, 1024, %s19_s20, [#allocation5], %s449_s28, %s449_s28, %s450_s29  }
  0x1e   :  { %443 = dma.done.wait [#allocation5], 1024  }
  0x1f   :  { %444 = vsyncadd [#allocation5], 4294966272  ;;  %v28_v0 = vlaneseq  ;;  %s31_s4 = sld [smem:[#allocation3]]  ;;  %s352_s5 = sld [smem:[#allocation3 + $0x1]] }
  0x20   :  { %s494_s6 = sld [smem:[#allocation3 + $0x2]]  ;;  %s496_s7 = sld [smem:[#allocation3 + $0x3]] }
  0x21   :  { %s498_s8 = sld [smem:[#allocation3 + $0x4]]  ;;  %s500_s9 = sld [smem:[#allocation3 + $0x5]]  ;;  %v506_v1 = vshrl.u32 %v28_v0, 7 }
  0x22   :  { %s502_s10 = sld [smem:[#allocation3 + $0x6]]  ;;  %s504_s11 = sld [smem:[#allocation3 + $0x7]] }
  0x23   :  { %s508_s1 = sld [smem:[#allocation3 + $0x8]]  ;;  %s510_s12 = sld [smem:[#allocation3 + $0x9]] }
  0x24   :  { %s512_s13 = sld [smem:[#allocation3 + $0xa]]  ;;  %s514_s14 = sld [smem:[#allocation3 + $0xb]] }
  0x25   :  { %s32_s15 = sshra.s32 %s31_s4, 3  ;;  %s33_s16 = sand.u32 7, %s31_s4 }
  0x26   :  { %s351_s17 = sshll.u32 %s32_s15, 3  ;;  %v37_v2 = vstv %s33_s16  ;;  %s49_s18 = sshra.s32 %s352_s5, 3 }
  0x27   :  { %vm38_vm0 = vcmp.eq.s32.totalorder %v506_v1, %v37_v2  ;;  %s50_s19 = sand.u32 7, %s352_s5  ;;  %s35_s20 = scalar_lea.vmem [#allocation4], %s351_s17 }
  0x28   :  { %v36_v3 = vld [vmem:[%s35_s20] sm:$0xff]  ;;  %s353_s21 = sshll.u32 %s49_s18, 3  ;;  %v54_v4 = vstv %s50_s19  ;;  %s66_s22 = sshra.s32 %s494_s6, 3 }
  0x29   :  { %v39_v5 = vsel %vm38_vm0, %v36_v3, 0.0  ;;  %vm55_vm1 = vcmp.eq.s32.totalorder %v506_v1, %v54_v4  ;;  %s67_s23 = sand.u32 7, %s494_s6  ;;  %s52_s24 = scalar_lea.vmem [#allocation4], %s353_s21 }
  0x2a   :  { %v40_v6 = vrot.slane %v39_v5, 4  ;;  %v53_v7 = vld [vmem:[%s52_s24] sm:$0xff]  ;;  %s355_s25 = sshll.u32 %s66_s22, 3  ;;  %v71_v8 = vstv %s67_s23  ;;  %s83_s26 = sshra.s32 %s496_s7, 3 }
  0x2b   :  { %v56_v9 = vsel %vm55_vm1, %v53_v7, 0.0  ;;  %vm72_vm2 = vcmp.eq.s32.totalorder %v506_v1, %v71_v8  ;;  %s84_s27 = sand.u32 7, %s496_s7  ;;  %s69_s0 = scalar_lea.vmem [#allocation4], %s355_s25 }
  0x2c   :  { %v41_v10 = vadd.f32 %v40_v6, %v39_v5  ;;  %v57_v11 = vrot.slane %v56_v9, 4  ;;  %v70_v12 = vld [vmem:[%s69_s0] sm:$0xff]  ;;  %s357_s30 = sshll.u32 %s83_s26, 3  ;;  %v88_v13 = vstv %s84_s27  ;;  %s100_s3 = sshra.s32 %s498_s8, 3 }
  0x2d   :  { %v73_v14 = vsel %vm72_vm2, %v70_v12, 0.0  ;;  %vm89_vm3 = vcmp.eq.s32.totalorder %v506_v1, %v88_v13  ;;  %s101_s4 = sand.u32 7, %s498_s8  ;;  %s86_s5 = scalar_lea.vmem [#allocation4], %s357_s30 }
  0x2e   :  { %v42_v15 = vrot.slane %v41_v10, 2  ;;  %v58_v16 = vadd.f32 %v57_v11, %v56_v9  ;;  %v74_v17 = vrot.slane %v73_v14, 4  ;;  %v87_v18 = vld [vmem:[%s86_s5] sm:$0xff]  ;;  %s359_s6 = sshll.u32 %s100_s3, 3  ;;  %v105_v19 = vstv %s101_s4  ;;  %s117_s7 = sshra.s32 %s500_s9, 3 }
  0x2f   :  { %v90_v20 = vsel %vm89_vm3, %v87_v18, 0.0  ;;  %vm106_vm4 = vcmp.eq.s32.totalorder %v506_v1, %v105_v19  ;;  %s118_s15 = sand.u32 7, %s500_s9  ;;  %s103_s8 = scalar_lea.vmem [#allocation4], %s359_s6 }
  0x30   :  { %v43_v21 = vadd.f32 %v42_v15, %v41_v10  ;;  %v59_v22 = vrot.slane %v58_v16, 2  ;;  %v75_v23 = vadd.f32 %v74_v17, %v73_v14  ;;  %v91_v24 = vrot.slane %v90_v20, 4  ;;  %v104_v25 = vld [vmem:[%s103_s8] sm:$0xff]  ;;  %s361_s16 = sshll.u32 %s117_s7, 3  ;;  %s134_s17 = sshra.s32 %s502_s10, 3 }
  0x31   :  { %v107_v26 = vsel %vm106_vm4, %v104_v25, 0.0  ;;  %v122_v27 = vstv %s118_s15  ;;  %s135_s18 = sand.u32 7, %s502_s10  ;;  %s120_s19 = scalar_lea.vmem [#allocation4], %s361_s16 }
  0x32   :  { %v44_v28 = vrot.slane %v43_v21, 1  ;;  %v60_v29 = vadd.f32 %v59_v22, %v58_v16  ;;  %v76_v30 = vrot.slane %v75_v23, 2  ;;  %v92_v31 = vadd.f32 %v91_v24, %v90_v20  ;;  %v121_v32 = vld [vmem:[%s120_s19] sm:$0xff]  ;;  %s363_s9 = sshll.u32 %s134_s17, 3  ;;  %s151_s20 = sshra.s32 %s504_s11, 3 }
  0x33   :  { %v108_v33 = vrot.slane %v107_v26, 4  ;;  %vm123_vm5 = vcmp.eq.s32.totalorder %v506_v1, %v122_v27  ;;  %v139_v34 = vstv %s135_s18  ;;  %s152_s21 = sand.u32 7, %s504_s11  ;;  %s137_s10 = scalar_lea.vmem [#allocation4], %s363_s9 }
  0x34   :  { %v45_v35 = vadd.f32 %v44_v28, %v43_v21  ;;  %v61_v36 = vrot.slane %v60_v29, 1  ;;  %v77_v37 = vadd.f32 %v76_v30, %v75_v23  ;;  %v93_v38 = vrot.slane %v92_v31, 2  ;;  %v138_v39 = vld [vmem:[%s137_s10] sm:$0xff]  ;;  %s365_s22 = sshll.u32 %s151_s20, 3  ;;  %s168_s23 = sshra.s32 %s508_s1, 3 }
  0x35   :  { %v109_v40 = vadd.f32 %v108_v33, %v107_v26  ;;  %v124_v41 = vsel %vm123_vm5, %v121_v32, 0.0  ;;  %vm140_vm6 = vcmp.eq.s32.totalorder %v506_v1, %v139_v34  ;;  %v156_v42 = vstv %s152_s21  ;;  %s169_s24 = sand.u32 7, %s508_s1  ;;  %s154_s11 = scalar_lea.vmem [#allocation4], %s365_s22 }
  0x36   :  { %46 = vst [vmem:[#allocation7] sm:$0x1] %v45_v35  ;;  %v62_v43 = vadd.f32 %v61_v36, %v60_v29  ;;  %v78_v44 = vrot.slane %v77_v37, 1  ;;  %v94_v45 = vadd.f32 %v93_v38, %v92_v31  ;;  %v125_v46 = vrot.slane %v124_v41, 4  ;;  %v155_v47 = vld [vmem:[%s154_s11] sm:$0xff]  ;;  %s367_s25 = sshll.u32 %s168_s23, 3 }
  0x37   :  { %s185_s26 = sshra.s32 %s510_s12, 3  ;;  %v110_v48 = vrot.slane %v109_v40, 2  ;;  %v141_v49 = vsel %vm140_vm6, %v138_v39, 0.0  ;;  %vm157_vm7 = vcmp.eq.s32.totalorder %v506_v1, %v156_v42  ;;  %v173_v50 = vstv %s169_s24  ;;  %s186_s27 = sand.u32 7, %s510_s12 }
  0x38   :  { %63 = vst [vmem:[#allocation7 + $0x1] sm:$0x1] %v62_v43  ;;  %v79_v51 = vadd.f32 %v78_v44, %v77_v37  ;;  %v95_v52 = vrot.slane %v94_v45, 1  ;;  %v126_v53 = vadd.f32 %v125_v46, %v124_v41  ;;  %v142_v54 = vrot.slane %v141_v49, 4  ;;  %s171_s1 = scalar_lea.vmem [#allocation4], %s367_s25  ;;  %s369_s0 = sshll.u32 %s185_s26, 3 }
  0x39   :  { %v172_v55 = vld [vmem:[%s171_s1] sm:$0xff]  ;;  %s202_s30 = sshra.s32 %s512_s13, 3  ;;  %v111_v56 = vadd.f32 %v110_v48, %v109_v40  ;;  %v158_v57 = vsel %vm157_vm7, %v155_v47, 0.0  ;;  %vm174_vm8 = vcmp.eq.s32.totalorder %v506_v1, %v173_v50  ;;  %v190_v58 = vstv %s186_s27  ;;  %s203_s3 = sand.u32 7, %s512_s13 }
  0x3a   :  { %80 = vst [vmem:[#allocation7 + $0x2] sm:$0x1] %v79_v51  ;;  %v96_v59 = vadd.f32 %v95_v52, %v94_v45  ;;  %v127_v60 = vrot.slane %v126_v53, 2  ;;  %v143_v61 = vadd.f32 %v142_v54, %v141_v49  ;;  %v159_v62 = vrot.slane %v158_v57, 4  ;;  %s188_s12 = scalar_lea.vmem [#allocation4], %s369_s0  ;;  %s371_s4 = sshll.u32 %s202_s30, 3 }
  0x3b   :  { %v189_v63 = vld [vmem:[%s188_s12] sm:$0xff]  ;;  %s219_s5 = sshra.s32 %s514_s14, 3  ;;  %v112_v0 = vrot.slane %v111_v56, 1  ;;  %v175_v2 = vsel %vm174_vm8, %v172_v55, 0.0  ;;  %vm191_vm9 = vcmp.eq.s32.totalorder %v506_v1, %v190_v58  ;;  %v207_v3 = vstv %s203_s3  ;;  %s220_s6 = sand.u32 7, %s514_s14 }
  0x3c   :  { %97 = vst [vmem:[#allocation7 + $0x3] sm:$0x1] %v96_v59  ;;  %v128_v4 = vadd.f32 %v127_v60, %v126_v53  ;;  %v144_v5 = vrot.slane %v143_v61, 2  ;;  %v160_v6 = vadd.f32 %v159_v62, %v158_v57  ;;  %v176_v7 = vrot.slane %v175_v2, 4  ;;  %s205_s13 = scalar_lea.vmem [#allocation4], %s371_s4  ;;  %s373_s7 = sshll.u32 %s219_s5, 3 }
  0x3d   :  { %v206_v8 = vld [vmem:[%s205_s13] sm:$0xff]  ;;  %s546_s15 = sld [smem:[#allocation3 + $0xc]]  ;;  %v113_v9 = vadd.f32 %v112_v0, %v111_v56  ;;  %v192_v10 = vsel %vm191_vm9, %v189_v63, 0.0  ;;  %vm208_vm10 = vcmp.eq.s32.totalorder %v506_v1, %v207_v3  ;;  %v224_v11 = vstv %s220_s6  ;;  %s549_s8 = sld [smem:[#allocation3 + $0xd]] }
  0x3e   :  { %v129_v12 = vrot.slane %v128_v4, 1  ;;  %v145_v13 = vadd.f32 %v144_v5, %v143_v61  ;;  %v161_v14 = vrot.slane %v160_v6, 2  ;;  %v177_v15 = vadd.f32 %v176_v7, %v175_v2  ;;  %s222_s14 = scalar_lea.vmem [#allocation4], %s373_s7  ;;  %s551_s16 = sld [smem:[#allocation3 + $0xe]] }
  0x3f   :  { %v223_v16 = vld [vmem:[%s222_s14] sm:$0xff]  ;;  %114 = vst [vmem:[#allocation7 + $0x4] sm:$0x1] %v113_v9  ;;  %v193_v17 = vrot.slane %v192_v10, 4  ;;  %v209_v18 = vsel %vm208_vm10, %v206_v8, 0.0  ;;  %vm225_vm11 = vcmp.eq.s32.totalorder %v506_v1, %v224_v11  ;;  %s554_s17 = sld [smem:[#allocation3 + $0xf]] }
  0x40   :  { %v130_v19 = vadd.f32 %v129_v12, %v128_v4  ;;  %v146_v20 = vrot.slane %v145_v13, 1  ;;  %v162_v21 = vadd.f32 %v161_v14, %v160_v6  ;;  %v178_v22 = vrot.slane %v177_v15, 2  ;;  %s451_s3 = smov [#allocation7]  }
  0x41   :  { %v194_v23 = vadd.f32 %v193_v17, %v192_v10  ;;  %v210_v24 = vrot.slane %v209_v18, 4  ;;  %v226_v25 = vsel %vm225_vm11, %v223_v16, 0.0  ;;  %s307_s12 = sshll.u32 %s451_s3, 4  ;;  %s308_s12 = int_to_ptr.vmem [resolvable:$true] %s307_s12 }
  0x42   :  { %131 = vst [vmem:[#allocation7 + $0x5] sm:$0x1] %v130_v19  ;;  %v147_v26 = vadd.f32 %v146_v20, %v145_v13  ;;  %v163_v27 = vrot.slane %v162_v21, 1  ;;  %v179_v28 = vadd.f32 %v178_v22, %v177_v15  ;;  %v227_v29 = vrot.slane %v226_v25, 4  ;;  %s419_s4 = scalar_lea.vmem %s308_s12, 256  ;;  %p424_p12 = scmp.lt.s32.totalorder %s308_s12, %s308_s12 }
  0x43   :  { %s236_s18 = sshra.s32 %s546_s15, 3  ;;  %s237_s19 = sand.u32 7, %s546_s15  ;;  %v195_v30 = vrot.slane %v194_v23, 2  ;;  %v211_v31 = vadd.f32 %v210_v24, %v209_v18 }
  0x44   :  { %s375_s9 = sshll.u32 %s236_s18, 3  ;;  %v241_v32 = vstv %s237_s19  ;;  %s253_s20 = sshra.s32 %s549_s8, 3  ;;  %148 = vst [vmem:[#allocation7 + $0x6] sm:$0x1] %v147_v26  ;;  %v164_v33 = vadd.f32 %v163_v27, %v162_v21  ;;  %v180_v34 = vrot.slane %v179_v28, 1  ;;  %v228_v35 = vadd.f32 %v227_v29, %v226_v25 }
  0x45   :  { %vm242_vm12 = vcmp.eq.s32.totalorder %v506_v1, %v241_v32  ;;  %s254_s21 = sand.u32 7, %s549_s8  ;;  %v196_v36 = vadd.f32 %v195_v30, %v194_v23  ;;  %v212_v37 = vrot.slane %v211_v31, 2  ;;  %s239_s10 = scalar_lea.vmem [#allocation4], %s375_s9 }
  0x46   :  { %v240_v38 = vld [vmem:[%s239_s10] sm:$0xff]  ;;  %s377_s22 = sshll.u32 %s253_s20, 3  ;;  %v258_v39 = vstv %s254_s21  ;;  %s270_s23 = sshra.s32 %s551_s16, 3  ;;  %165 = vst [vmem:[#allocation7 + $0x7] sm:$0x1] %v164_v33  ;;  %v181_v40 = vadd.f32 %v180_v34, %v179_v28  ;;  %v229_v41 = vrot.slane %v228_v35, 2 }
  0x47   :  { %v243_v42 = vsel %vm242_vm12, %v240_v38, 0.0  ;;  %vm259_vm13 = vcmp.eq.s32.totalorder %v506_v1, %v258_v39  ;;  %s271_s24 = sand.u32 7, %s551_s16  ;;  %v197_v43 = vrot.slane %v196_v36, 1  ;;  %v213_v44 = vadd.f32 %v212_v37, %v211_v31  ;;  %s256_s11 = scalar_lea.vmem [#allocation4], %s377_s22 }
  0x48   :  { %v244_v45 = vrot.slane %v243_v42, 4  ;;  %v257_v46 = vld [vmem:[%s256_s11] sm:$0xff]  ;;  %s379_s25 = sshll.u32 %s270_s23, 3  ;;  %v275_v47 = vstv %s271_s24  ;;  %s287_s26 = sshra.s32 %s554_s17, 3  ;;  %182 = vst [vmem:[#allocation7 + $0x8] sm:$0x1] %v181_v40  ;;  %v230_v48 = vadd.f32 %v229_v41, %v228_v35 }
  0x49   :  { %v260_v49 = vsel %vm259_vm13, %v257_v46, 0.0  ;;  %vm276_vm14 = vcmp.eq.s32.totalorder %v506_v1, %v275_v47  ;;  %s288_s27 = sand.u32 7, %s554_s17  ;;  %v198_v50 = vadd.f32 %v197_v43, %v196_v36  ;;  %v214_v51 = vrot.slane %v213_v44, 1  ;;  %s273_s1 = scalar_lea.vmem [#allocation4], %s379_s25 }
  0x4a   :  { %v245_v52 = vadd.f32 %v244_v45, %v243_v42  ;;  %v261_v53 = vrot.slane %v260_v49, 4  ;;  %v274_v54 = vld [vmem:[%s273_s1] sm:$0xff]  ;;  %s381_s0 = sshll.u32 %s287_s26, 3  ;;  %v231_v55 = vrot.slane %v230_v48, 1  ;;  %v292_v57 = vstv %s288_s27  ;;  %p420_p11 = scmp.ne.s32.totalorder %s308_s12, %s419_s4 }
  0x4b   :  { %v277_v56 = vsel %vm276_vm14, %v274_v54, 0.0  ;;  %199 = vst [vmem:[#allocation7 + $0x9] sm:$0x1] %v198_v50  ;;  %v215_v58 = vadd.f32 %v214_v51, %v213_v44  ;;  %s290_s30 = scalar_lea.vmem [#allocation4], %s381_s0  ;;  %vm293_vm15 = vcmp.eq.s32.totalorder %v506_v1, %v292_v57  ;;  %p425_p13 = scmp.lt.s32.totalorder %s419_s4, %s419_s4 }
  0x4c   :  { %v246_v59 = vrot.slane %v245_v52, 2  ;;  %v262_v60 = vadd.f32 %v261_v53, %v260_v49  ;;  %v278_v61 = vrot.slane %v277_v56, 4  ;;  %v291_v62 = vld [vmem:[%s290_s30] sm:$0xff]  ;;  %v232_v63 = vadd.f32 %v231_v55, %v230_v48 }
  0x4d   :  { %216 = vst [vmem:[#allocation7 + $0xa] sm:$0x1] %v215_v58  ;;  %v294_v4 = vsel %vm293_vm15, %v291_v62, 0.0  ;;  %p426_p0 = por %p425_p13, %p424_p12 }
  0x4e   :  { %v247_v0 = vadd.f32 %v246_v59, %v245_v52  ;;  %v263_v2 = vrot.slane %v262_v60, 2  ;;  %v279_v3 = vadd.f32 %v278_v61, %v277_v56  ;;  %233 = vst [vmem:[#allocation7 + $0xb] sm:$0x1] %v232_v63  ;;  %v295_v5 = vrot.slane %v294_v4, 4 }
  0x4f   :  { %p427_p1 = pnand %p426_p0, %p420_p11 }
  0x50   :  { %v248_v6 = vrot.slane %v247_v0, 1  ;;  %v264_v7 = vadd.f32 %v263_v2, %v262_v60  ;;  %v280_v8 = vrot.slane %v279_v3, 2  ;;  %v296_v9 = vadd.f32 %v295_v5, %v294_v4 }
  0x52   :  { %v249_v10 = vadd.f32 %v248_v6, %v247_v0  ;;  %v265_v11 = vrot.slane %v264_v7, 1  ;;  %v281_v12 = vadd.f32 %v280_v8, %v279_v3  ;;  %v297_v13 = vrot.slane %v296_v9, 2 }
  0x54   :  { %250 = vst [vmem:[#allocation7 + $0xc] sm:$0x1] %v249_v10  ;;  %v266_v14 = vadd.f32 %v265_v11, %v264_v7  ;;  %v282_v15 = vrot.slane %v281_v12, 1  ;;  %v298_v16 = vadd.f32 %v297_v13, %v296_v9 }
  0x56   :  { %267 = vst [vmem:[#allocation7 + $0xd] sm:$0x1] %v266_v14  ;;  %v283_v1 = vadd.f32 %v282_v15, %v281_v12  ;;  %v299_v17 = vrot.slane %v298_v16, 1 }
  0x58   :  { %284 = vst [vmem:[#allocation7 + $0xe] sm:$0x1] %v283_v1  ;;  %v300_v18 = vadd.f32 %v299_v17, %v298_v16 }
  0x5a   :  { %301 = vst [vmem:[#allocation7 + $0xf] sm:$0x1] %v300_v18 }
  0x5b   :  { %430 = shalt.err (!%p427_p1)
}
  0x5c   :  { %s431_s13 = scalar_lea.hbm %s585_s2, 256 }
  0x5d   :  { %p432_p2 = scmp.ne.s32.totalorder %s585_s2, %s431_s13  ;;  %p435_p3 = scmp.lt.u32.totalorder %s431_s13, %s585_s2 }
  0x5f   :  { %p437_p4 = pnand %p435_p3, %p432_p2 }
  0x61   :  { %440 = shalt.err (!%p437_p4)
}
  0x62   :  { %313 = dma.vmem_to_hbm [thread:$0]  %s308_s12, 256, %s585_s2, [#allocation6], %s449_s28, %s449_s28, %s450_s29  }
  0x63   :  { %445 = dma.done.wait [#allocation6], 256  }
  0x64   :  { %446 = vsyncadd [#allocation6], 4294967040 }
  0x65   :  { %317 = vsyncpa [#allocation5], 1 }
  0x66   :  { %318 = vsyncpa [#allocation6], 1 }

</bundles_post_ra>
